<compile_context>
chip_gen: v5e
topology: v5e:2x2
jax: 0.10.0
libtpu: 0.0.40
codegen_flags: <defaults>
</compile_context>

<pallas_src>
import functools

import jax
import jax.numpy as jnp
from jax import lax
from jax.experimental import pallas as pl
from jax.experimental.pallas import tpu as pltpu

BS = 4  # block_size, fixed to 4 as in the reference module


def _s2d_kernel(x_ref, sel_ref, o_ref, *, compute_dtype, precision):
    # x_ref:   (1, Rb, 4*W)   lanes l = i*W + 4*w' + j
    # sel_ref: (W, W)         resident block-diagonal de-interleave one-hot
    # o_ref:   (1, 16, Rb, W4)
    W = sel_ref.shape[0]
    W4 = W // BS

    sel = sel_ref[...]                                   # (W, W), fetched once
    xall = x_ref[0].astype(compute_dtype)                # (Rb, 4W); no-op for bf16/f32

    for i in range(BS):                                  # unrolled: 4 lane segments
        xi = xall[:, i * W:(i + 1) * W]                  # (Rb, W), static lane slice
        # Exact permutation: every output element is x * 1.0 summed with zeros.
        yi = jnp.dot(xi, sel, preferred_element_type=jnp.float32,
                     precision=precision)                # (Rb, W), lanes = j*W4 + w'
        for j in range(BS):
            o_ref[0, BS * i + j, :, :] = yi[:, j * W4:(j + 1) * W4].astype(o_ref.dtype)


def _vmem_capacity_bytes():
    """Physical VMEM per TensorCore; conservative 64 MiB (v7x) fallback."""
    try:
        cap = int(getattr(pltpu.get_tpu_info(), "vmem_capacity_bytes", 0))
        if cap > 0:
            return cap
    except Exception:
        pass
    return 64 << 20


def _pick_row_tile(R, N, W, in_item, comp_item, vmem_cap):
    """Row tile Rb: multiple of 8 (or full R), divides R, fits the VMEM budget
    (including the double-buffered in/out blocks, the resident sel operand and
    the in-kernel temporaries), and leaves >= 2 total grid steps when possible
    so both v7x TensorCores get work.  Returns (Rb, estimated_vmem_bytes)."""
    pad128 = lambda v: -(-v // 128) * 128
    pad8 = lambda v: -(-v // 8) * 8
    W4 = W // BS
    out_item = in_item
    per_row = (2 * pad128(BS * W) * in_item              # input block, double-buffered
               + 2 * BS * BS * pad128(W4) * out_item     # output block, double-buffered
               + pad128(BS * W) * comp_item              # xall temporary
               + pad128(W) * 4)                          # yi f32 temporary
    fixed = 2 * pad8(W) * pad128(W) * comp_item          # resident sel (double-buffered)
    budget = int(0.45 * vmem_cap)
    cap_rows = max(8, (budget - fixed) // per_row)

    divs = [d for d in range(8, R + 1, 8) if R % d == 0]
    if not divs:
        # No multiple-of-8 divisor: full-extent block is the only legal choice.
        # (Can overshoot the budget only for pathological R; typical CNN shapes
        # have C*H4 a multiple of 8.)
        return R, fixed + per_row * R
    fitting = [d for d in divs if d <= cap_rows] or [divs[0]]
    Rb = max(fitting)
    if N * (R // Rb) < 2:                                 # keep both v7x TCs busy
        halves = [d for d in fitting if R // d >= 2]
        if halves:
            Rb = max(halves)
    return Rb, fixed + per_row * Rb


def space_to_depth(x, block_size=4):
    assert block_size == BS
    N, C, H, W = x.shape
    assert H % BS == 0 and W % BS == 0
    if not jnp.issubdtype(x.dtype, jnp.floating):
        # TODO(synk): int/bool inputs need a non-MXU permutation path.
        raise NotImplementedError("space_to_depth Pallas kernel supports float dtypes only")

    H4, W4 = H // BS, W // BS
    R = C * H4

    # Dtype-aware MXU path: bf16 stays native (default precision is bit-exact
    # for a 0/1 matrix); anything else (f32, f16, ...) goes through f32+HIGHEST.
    if x.dtype == jnp.bfloat16:
        comp_dtype, precision = jnp.bfloat16, lax.Precision.DEFAULT
    else:
        comp_dtype, precision = jnp.float32, lax.Precision.HIGHEST

    # Hoisted, block-diagonal lane de-interleave one-hot:
    #   sel[w, j*W4 + w'] = 1  iff  w == 4*w' + j
    d = jnp.arange(W, dtype=jnp.int32)
    src = BS * (d % W4) + d // W4
    sel = (jnp.arange(W, dtype=jnp.int32)[:, None] == src[None, :]).astype(comp_dtype)

    cap = _vmem_capacity_bytes()
    Rb, vmem_usage = _pick_row_tile(R, N, W, x.dtype.itemsize,
                                    jnp.dtype(comp_dtype).itemsize, cap)
    vmem_limit = int(min(cap - (4 << 20),
                         max(32 << 20, int(1.5 * vmem_usage) + (8 << 20))))

    x6 = x.reshape(N, R, BS * W)                          # metadata-only view

    grid = (N, R // Rb)                                   # both axes independent
    kernel = functools.partial(_s2d_kernel, compute_dtype=comp_dtype,
                               precision=precision)

    out7 = pl.pallas_call(
        kernel,
        out_shape=jax.ShapeDtypeStruct((N, BS * BS, R, W4), x.dtype),
        grid=grid,
        in_specs=[
            pl.BlockSpec((1, Rb, BS * W), lambda n, r: (n, r, 0)),
            pl.BlockSpec((W, W), lambda n, r: (0, 0)),    # constant index: DMA'd once
        ],
        out_specs=pl.BlockSpec((1, BS * BS, Rb, W4), lambda n, r: (n, 0, r, 0)),
        compiler_params=pltpu.CompilerParams(
            dimension_semantics=("parallel", "parallel"),
            vmem_limit_bytes=vmem_limit),
        cost_estimate=pl.CostEstimate(
            flops=2 * N * R * BS * W * W,                 # 4 (Rb,W)x(W,W) one-hot dots/step
            transcendentals=0,
            bytes_accessed=2 * x.size * x.dtype.itemsize
                           + sel.size * sel.dtype.itemsize),
    )(x6, sel)                                            # (N, 16, C*H4, W4)

    return out7.reshape(N, C * BS * BS, H4, W4)           # metadata-only


def _reference(x, block_size=4):
    N, C, H, W = x.shape
    bs = block_size
    y = x.reshape(N, C, H // bs, bs, W // bs, bs)
    y = jnp.transpose(y, (0, 3, 5, 1, 2, 4))
    return y.reshape(N, C * bs * bs, H // bs, W // bs)


if __name__ == "__main__":
    key = jax.random.PRNGKey(0)
    N, C, H, W = 2, 4, 16, 16
    x = jax.random.normal(key, (N, C, H, W), dtype=jnp.float32)

    # f32 path (HIGHEST precision on the one-hot: exact permutation).
    y = jax.block_until_ready(space_to_depth(x))
    y_ref = _reference(x)
    assert y.shape == (N, C * 16, H // 4, W // 4), y.shape
    assert jnp.array_equal(y, y_ref), "f32 mismatch vs reference"

    # bf16 path (native dtype, default precision: still bit-exact).
    xb = x.astype(jnp.bfloat16)
    yb = jax.block_until_ready(space_to_depth(xb))
    assert jnp.array_equal(yb, _reference(xb)), "bf16 mismatch vs reference"

    print("KERNEL_OK")
</pallas_src>

<mosaic_0001>
module attributes {stable_mosaic.version = 11 : i64} {
  func.func @_s2d_kernel(%arg0: i32, %arg1: i32, %arg2: memref<1x16x64xf32, #tpu.memory_space<vmem>>, %arg3: memref<16x16xf32, #tpu.memory_space<vmem>>, %arg4: memref<1x16x16x4xf32, #tpu.memory_space<vmem>>) attributes {dimension_semantics = [#tpu.dimension_semantics<parallel>, #tpu.dimension_semantics<parallel>], iteration_bounds = array<i64: 2, 1>, scalar_prefetch = 0 : i64, scratch_operands = 0 : i64, tpu.core_type = #tpu.core_type<tc>, window_params = [{transform_indices = @transform_0, window_bounds = array<i64: 1, 16, 64>}, {pipeline_mode = #tpu.pipeline_mode<synchronous>, transform_indices = @transform_1, window_bounds = array<i64: 16, 16>}, {transform_indices = @transform_2, window_bounds = array<i64: 1, 16, 16, 4>}]} {
    %c0 = arith.constant 0 : index
    %c0_0 = arith.constant 0 : index
    %0 = vector.load %arg3[%c0, %c0_0] : memref<16x16xf32, #tpu.memory_space<vmem>>, vector<16x16xf32>
    %c0_1 = arith.constant 0 : index
    %c0_2 = arith.constant 0 : index
    %c0_3 = arith.constant 0 : index
    %1 = vector.load %arg2[%c0_1, %c0_2, %c0_3] : memref<1x16x64xf32, #tpu.memory_space<vmem>>, vector<1x16x64xf32>
    %2 = vector.shape_cast %1 : vector<1x16x64xf32> to vector<16x64xf32>
    %3 = vector.extract_strided_slice %2 {offsets = [0, 0], sizes = [16, 16], strides = [1, 1]} : vector<16x64xf32> to vector<16x16xf32>
    %cst = arith.constant dense<0.000000e+00> : vector<16x16xf32>
    %4 = tpu.matmul %3, %0, %cst {dimension_numbers = #tpu.dot_dimension_numbers<[1], [0], [0], [1], [0, 0, 1, 1], [], []>, precision = #tpu.contract_precision<fp32>} : vector<16x16xf32>, vector<16x16xf32>, vector<16x16xf32> -> vector<16x16xf32>
    %5 = vector.extract_strided_slice %4 {offsets = [0, 0], sizes = [16, 4], strides = [1, 1]} : vector<16x16xf32> to vector<16x4xf32>
    %c0_4 = arith.constant 0 : index
    %c0_5 = arith.constant 0 : index
    %c0_6 = arith.constant 0 : index
    %c0_7 = arith.constant 0 : index
    %6 = vector.load %arg4[%c0_4, %c0_5, %c0_6, %c0_7] : memref<1x16x16x4xf32, #tpu.memory_space<vmem>>, vector<1x1x16x4xf32>
    %7 = vector.shape_cast %6 : vector<1x1x16x4xf32> to vector<16x4xf32>
    %8 = vector.shape_cast %5 : vector<16x4xf32> to vector<1x1x16x4xf32>
    tpu.vector_store %arg4[%c0_4, %c0_5, %c0_6, %c0_7], %8 {strides = array<i32>} : memref<1x16x16x4xf32, #tpu.memory_space<vmem>>, vector<1x1x16x4xf32>,
    %9 = vector.extract_strided_slice %4 {offsets = [0, 4], sizes = [16, 4], strides = [1, 1]} : vector<16x16xf32> to vector<16x4xf32>
    %c0_8 = arith.constant 0 : index
    %c1 = arith.constant 1 : index
    %c0_9 = arith.constant 0 : index
    %c0_10 = arith.constant 0 : index
    %10 = vector.load %arg4[%c0_8, %c1, %c0_9, %c0_10] : memref<1x16x16x4xf32, #tpu.memory_space<vmem>>, vector<1x1x16x4xf32>
    %11 = vector.shape_cast %10 : vector<1x1x16x4xf32> to vector<16x4xf32>
    %12 = vector.shape_cast %9 : vector<16x4xf32> to vector<1x1x16x4xf32>
    tpu.vector_store %arg4[%c0_8, %c1, %c0_9, %c0_10], %12 {strides = array<i32>} : memref<1x16x16x4xf32, #tpu.memory_space<vmem>>, vector<1x1x16x4xf32>,
    %13 = vector.extract_strided_slice %4 {offsets = [0, 8], sizes = [16, 4], strides = [1, 1]} : vector<16x16xf32> to vector<16x4xf32>
    %c0_11 = arith.constant 0 : index
    %c2 = arith.constant 2 : index
    %c0_12 = arith.constant 0 : index
    %c0_13 = arith.constant 0 : index
    %14 = vector.load %arg4[%c0_11, %c2, %c0_12, %c0_13] : memref<1x16x16x4xf32, #tpu.memory_space<vmem>>, vector<1x1x16x4xf32>
    %15 = vector.shape_cast %14 : vector<1x1x16x4xf32> to vector<16x4xf32>
    %16 = vector.shape_cast %13 : vector<16x4xf32> to vector<1x1x16x4xf32>
    tpu.vector_store %arg4[%c0_11, %c2, %c0_12, %c0_13], %16 {strides = array<i32>} : memref<1x16x16x4xf32, #tpu.memory_space<vmem>>, vector<1x1x16x4xf32>,
    %17 = vector.extract_strided_slice %4 {offsets = [0, 12], sizes = [16, 4], strides = [1, 1]} : vector<16x16xf32> to vector<16x4xf32>
    %c0_14 = arith.constant 0 : index
    %c3 = arith.constant 3 : index
    %c0_15 = arith.constant 0 : index
    %c0_16 = arith.constant 0 : index
    %18 = vector.load %arg4[%c0_14, %c3, %c0_15, %c0_16] : memref<1x16x16x4xf32, #tpu.memory_space<vmem>>, vector<1x1x16x4xf32>
    %19 = vector.shape_cast %18 : vector<1x1x16x4xf32> to vector<16x4xf32>
    %20 = vector.shape_cast %17 : vector<16x4xf32> to vector<1x1x16x4xf32>
    tpu.vector_store %arg4[%c0_14, %c3, %c0_15, %c0_16], %20 {strides = array<i32>} : memref<1x16x16x4xf32, #tpu.memory_space<vmem>>, vector<1x1x16x4xf32>,
    %21 = vector.extract_strided_slice %2 {offsets = [0, 16], sizes = [16, 16], strides = [1, 1]} : vector<16x64xf32> to vector<16x16xf32>
    %cst_17 = arith.constant dense<0.000000e+00> : vector<16x16xf32>
    %22 = tpu.matmul %21, %0, %cst_17 {dimension_numbers = #tpu.dot_dimension_numbers<[1], [0], [0], [1], [0, 0, 1, 1], [], []>, precision = #tpu.contract_precision<fp32>} : vector<16x16xf32>, vector<16x16xf32>, vector<16x16xf32> -> vector<16x16xf32>
    %23 = vector.extract_strided_slice %22 {offsets = [0, 0], sizes = [16, 4], strides = [1, 1]} : vector<16x16xf32> to vector<16x4xf32>
    %c0_18 = arith.constant 0 : index
    %c4 = arith.constant 4 : index
    %c0_19 = arith.constant 0 : index
    %c0_20 = arith.constant 0 : index
    %24 = vector.load %arg4[%c0_18, %c4, %c0_19, %c0_20] : memref<1x16x16x4xf32, #tpu.memory_space<vmem>>, vector<1x1x16x4xf32>
    %25 = vector.shape_cast %24 : vector<1x1x16x4xf32> to vector<16x4xf32>
    %26 = vector.shape_cast %23 : vector<16x4xf32> to vector<1x1x16x4xf32>
    tpu.vector_store %arg4[%c0_18, %c4, %c0_19, %c0_20], %26 {strides = array<i32>} : memref<1x16x16x4xf32, #tpu.memory_space<vmem>>, vector<1x1x16x4xf32>,
    %27 = vector.extract_strided_slice %22 {offsets = [0, 4], sizes = [16, 4], strides = [1, 1]} : vector<16x16xf32> to vector<16x4xf32>
    %c0_21 = arith.constant 0 : index
    %c5 = arith.constant 5 : index
    %c0_22 = arith.constant 0 : index
    %c0_23 = arith.constant 0 : index
    %28 = vector.load %arg4[%c0_21, %c5, %c0_22, %c0_23] : memref<1x16x16x4xf32, #tpu.memory_space<vmem>>, vector<1x1x16x4xf32>
    %29 = vector.shape_cast %28 : vector<1x1x16x4xf32> to vector<16x4xf32>
    %30 = vector.shape_cast %27 : vector<16x4xf32> to vector<1x1x16x4xf32>
    tpu.vector_store %arg4[%c0_21, %c5, %c0_22, %c0_23], %30 {strides = array<i32>} : memref<1x16x16x4xf32, #tpu.memory_space<vmem>>, vector<1x1x16x4xf32>,
    %31 = vector.extract_strided_slice %22 {offsets = [0, 8], sizes = [16, 4], strides = [1, 1]} : vector<16x16xf32> to vector<16x4xf32>
    %c0_24 = arith.constant 0 : index
    %c6 = arith.constant 6 : index
    %c0_25 = arith.constant 0 : index
    %c0_26 = arith.constant 0 : index
    %32 = vector.load %arg4[%c0_24, %c6, %c0_25, %c0_26] : memref<1x16x16x4xf32, #tpu.memory_space<vmem>>, vector<1x1x16x4xf32>
    %33 = vector.shape_cast %32 : vector<1x1x16x4xf32> to vector<16x4xf32>
    %34 = vector.shape_cast %31 : vector<16x4xf32> to vector<1x1x16x4xf32>
    tpu.vector_store %arg4[%c0_24, %c6, %c0_25, %c0_26], %34 {strides = array<i32>} : memref<1x16x16x4xf32, #tpu.memory_space<vmem>>, vector<1x1x16x4xf32>,
    %35 = vector.extract_strided_slice %22 {offsets = [0, 12], sizes = [16, 4], strides = [1, 1]} : vector<16x16xf32> to vector<16x4xf32>
    %c0_27 = arith.constant 0 : index
    %c7 = arith.constant 7 : index
    %c0_28 = arith.constant 0 : index
    %c0_29 = arith.constant 0 : index
    %36 = vector.load %arg4[%c0_27, %c7, %c0_28, %c0_29] : memref<1x16x16x4xf32, #tpu.memory_space<vmem>>, vector<1x1x16x4xf32>
    %37 = vector.shape_cast %36 : vector<1x1x16x4xf32> to vector<16x4xf32>
    %38 = vector.shape_cast %35 : vector<16x4xf32> to vector<1x1x16x4xf32>
    tpu.vector_store %arg4[%c0_27, %c7, %c0_28, %c0_29], %38 {strides = array<i32>} : memref<1x16x16x4xf32, #tpu.memory_space<vmem>>, vector<1x1x16x4xf32>,
    %39 = vector.extract_strided_slice %2 {offsets = [0, 32], sizes = [16, 16], strides = [1, 1]} : vector<16x64xf32> to vector<16x16xf32>
    %cst_30 = arith.constant dense<0.000000e+00> : vector<16x16xf32>
    %40 = tpu.matmul %39, %0, %cst_30 {dimension_numbers = #tpu.dot_dimension_numbers<[1], [0], [0], [1], [0, 0, 1, 1], [], []>, precision = #tpu.contract_precision<fp32>} : vector<16x16xf32>, vector<16x16xf32>, vector<16x16xf32> -> vector<16x16xf32>
    %41 = vector.extract_strided_slice %40 {offsets = [0, 0], sizes = [16, 4], strides = [1, 1]} : vector<16x16xf32> to vector<16x4xf32>
    %c0_31 = arith.constant 0 : index
    %c8 = arith.constant 8 : index
    %c0_32 = arith.constant 0 : index
    %c0_33 = arith.constant 0 : index
    %42 = vector.load %arg4[%c0_31, %c8, %c0_32, %c0_33] : memref<1x16x16x4xf32, #tpu.memory_space<vmem>>, vector<1x1x16x4xf32>
    %43 = vector.shape_cast %42 : vector<1x1x16x4xf32> to vector<16x4xf32>
    %44 = vector.shape_cast %41 : vector<16x4xf32> to vector<1x1x16x4xf32>
    tpu.vector_store %arg4[%c0_31, %c8, %c0_32, %c0_33], %44 {strides = array<i32>} : memref<1x16x16x4xf32, #tpu.memory_space<vmem>>, vector<1x1x16x4xf32>,
    %45 = vector.extract_strided_slice %40 {offsets = [0, 4], sizes = [16, 4], strides = [1, 1]} : vector<16x16xf32> to vector<16x4xf32>
    %c0_34 = arith.constant 0 : index
    %c9 = arith.constant 9 : index
    %c0_35 = arith.constant 0 : index
    %c0_36 = arith.constant 0 : index
    %46 = vector.load %arg4[%c0_34, %c9, %c0_35, %c0_36] : memref<1x16x16x4xf32, #tpu.memory_space<vmem>>, vector<1x1x16x4xf32>
    %47 = vector.shape_cast %46 : vector<1x1x16x4xf32> to vector<16x4xf32>
    %48 = vector.shape_cast %45 : vector<16x4xf32> to vector<1x1x16x4xf32>
    tpu.vector_store %arg4[%c0_34, %c9, %c0_35, %c0_36], %48 {strides = array<i32>} : memref<1x16x16x4xf32, #tpu.memory_space<vmem>>, vector<1x1x16x4xf32>,
    %49 = vector.extract_strided_slice %40 {offsets = [0, 8], sizes = [16, 4], strides = [1, 1]} : vector<16x16xf32> to vector<16x4xf32>
    %c0_37 = arith.constant 0 : index
    %c10 = arith.constant 10 : index
    %c0_38 = arith.constant 0 : index
    %c0_39 = arith.constant 0 : index
    %50 = vector.load %arg4[%c0_37, %c10, %c0_38, %c0_39] : memref<1x16x16x4xf32, #tpu.memory_space<vmem>>, vector<1x1x16x4xf32>
    %51 = vector.shape_cast %50 : vector<1x1x16x4xf32> to vector<16x4xf32>
    %52 = vector.shape_cast %49 : vector<16x4xf32> to vector<1x1x16x4xf32>
    tpu.vector_store %arg4[%c0_37, %c10, %c0_38, %c0_39], %52 {strides = array<i32>} : memref<1x16x16x4xf32, #tpu.memory_space<vmem>>, vector<1x1x16x4xf32>,
    %53 = vector.extract_strided_slice %40 {offsets = [0, 12], sizes = [16, 4], strides = [1, 1]} : vector<16x16xf32> to vector<16x4xf32>
    %c0_40 = arith.constant 0 : index
    %c11 = arith.constant 11 : index
    %c0_41 = arith.constant 0 : index
    %c0_42 = arith.constant 0 : index
    %54 = vector.load %arg4[%c0_40, %c11, %c0_41, %c0_42] : memref<1x16x16x4xf32, #tpu.memory_space<vmem>>, vector<1x1x16x4xf32>
    %55 = vector.shape_cast %54 : vector<1x1x16x4xf32> to vector<16x4xf32>
    %56 = vector.shape_cast %53 : vector<16x4xf32> to vector<1x1x16x4xf32>
    tpu.vector_store %arg4[%c0_40, %c11, %c0_41, %c0_42], %56 {strides = array<i32>} : memref<1x16x16x4xf32, #tpu.memory_space<vmem>>, vector<1x1x16x4xf32>,
    %57 = vector.extract_strided_slice %2 {offsets = [0, 48], sizes = [16, 16], strides = [1, 1]} : vector<16x64xf32> to vector<16x16xf32>
    %cst_43 = arith.constant dense<0.000000e+00> : vector<16x16xf32>
    %58 = tpu.matmul %57, %0, %cst_43 {dimension_numbers = #tpu.dot_dimension_numbers<[1], [0], [0], [1], [0, 0, 1, 1], [], []>, precision = #tpu.contract_precision<fp32>} : vector<16x16xf32>, vector<16x16xf32>, vector<16x16xf32> -> vector<16x16xf32>
    %59 = vector.extract_strided_slice %58 {offsets = [0, 0], sizes = [16, 4], strides = [1, 1]} : vector<16x16xf32> to vector<16x4xf32>
    %c0_44 = arith.constant 0 : index
    %c12 = arith.constant 12 : index
    %c0_45 = arith.constant 0 : index
    %c0_46 = arith.constant 0 : index
    %60 = vector.load %arg4[%c0_44, %c12, %c0_45, %c0_46] : memref<1x16x16x4xf32, #tpu.memory_space<vmem>>, vector<1x1x16x4xf32>
    %61 = vector.shape_cast %60 : vector<1x1x16x4xf32> to vector<16x4xf32>
    %62 = vector.shape_cast %59 : vector<16x4xf32> to vector<1x1x16x4xf32>
    tpu.vector_store %arg4[%c0_44, %c12, %c0_45, %c0_46], %62 {strides = array<i32>} : memref<1x16x16x4xf32, #tpu.memory_space<vmem>>, vector<1x1x16x4xf32>,
    %63 = vector.extract_strided_slice %58 {offsets = [0, 4], sizes = [16, 4], strides = [1, 1]} : vector<16x16xf32> to vector<16x4xf32>
    %c0_47 = arith.constant 0 : index
    %c13 = arith.constant 13 : index
    %c0_48 = arith.constant 0 : index
    %c0_49 = arith.constant 0 : index
    %64 = vector.load %arg4[%c0_47, %c13, %c0_48, %c0_49] : memref<1x16x16x4xf32, #tpu.memory_space<vmem>>, vector<1x1x16x4xf32>
    %65 = vector.shape_cast %64 : vector<1x1x16x4xf32> to vector<16x4xf32>
    %66 = vector.shape_cast %63 : vector<16x4xf32> to vector<1x1x16x4xf32>
    tpu.vector_store %arg4[%c0_47, %c13, %c0_48, %c0_49], %66 {strides = array<i32>} : memref<1x16x16x4xf32, #tpu.memory_space<vmem>>, vector<1x1x16x4xf32>,
    %67 = vector.extract_strided_slice %58 {offsets = [0, 8], sizes = [16, 4], strides = [1, 1]} : vector<16x16xf32> to vector<16x4xf32>
    %c0_50 = arith.constant 0 : index
    %c14 = arith.constant 14 : index
    %c0_51 = arith.constant 0 : index
    %c0_52 = arith.constant 0 : index
    %68 = vector.load %arg4[%c0_50, %c14, %c0_51, %c0_52] : memref<1x16x16x4xf32, #tpu.memory_space<vmem>>, vector<1x1x16x4xf32>
    %69 = vector.shape_cast %68 : vector<1x1x16x4xf32> to vector<16x4xf32>
    %70 = vector.shape_cast %67 : vector<16x4xf32> to vector<1x1x16x4xf32>
    tpu.vector_store %arg4[%c0_50, %c14, %c0_51, %c0_52], %70 {strides = array<i32>} : memref<1x16x16x4xf32, #tpu.memory_space<vmem>>, vector<1x1x16x4xf32>,
    %71 = vector.extract_strided_slice %58 {offsets = [0, 12], sizes = [16, 4], strides = [1, 1]} : vector<16x16xf32> to vector<16x4xf32>
    %c0_53 = arith.constant 0 : index
    %c15 = arith.constant 15 : index
    %c0_54 = arith.constant 0 : index
    %c0_55 = arith.constant 0 : index
    %72 = vector.load %arg4[%c0_53, %c15, %c0_54, %c0_55] : memref<1x16x16x4xf32, #tpu.memory_space<vmem>>, vector<1x1x16x4xf32>
    %73 = vector.shape_cast %72 : vector<1x1x16x4xf32> to vector<16x4xf32>
    %74 = vector.shape_cast %71 : vector<16x4xf32> to vector<1x1x16x4xf32>
    tpu.vector_store %arg4[%c0_53, %c15, %c0_54, %c0_55], %74 {strides = array<i32>} : memref<1x16x16x4xf32, #tpu.memory_space<vmem>>, vector<1x1x16x4xf32>,
    return
  }
  func.func @transform_0(%arg0: i32, %arg1: i32) -> (i32, i32, i32) {
    %c0_i32 = arith.constant 0 : i32
    %c0_i32_0 = arith.constant 0 : i32
    return %arg0, %arg1, %c0_i32 : i32, i32, i32
  }
  func.func @transform_1(%arg0: i32, %arg1: i32) -> (i32, i32) {
    %c0_i32 = arith.constant 0 : i32
    %c0_i32_0 = arith.constant 0 : i32
    %c0_i32_1 = arith.constant 0 : i32
    return %c0_i32, %c0_i32_0 : i32, i32
  }
  func.func @transform_2(%arg0: i32, %arg1: i32) -> (i32, i32, i32, i32) {
    %c0_i32 = arith.constant 0 : i32
    %c0_i32_0 = arith.constant 0 : i32
    %c0_i32_1 = arith.constant 0 : i32
    return %arg0, %c0_i32, %arg1, %c0_i32_0 : i32, i32, i32, i32
  }
}

</mosaic_0001>

<bundles_post_ra>
// kernel: tpu_custom_call.1
= control target key start
LH: loop header
LB: loop body
LE: loop exit
PB: predicated region body
PF: predicated region fallthrough
CT: control target
= control target key end

     0   :  { %7 = vsyncpa [#allocation3], 0  ;;  %s1785_s0 = inlined_call_operand.hbm [shape: f32[2,16,64], index: 0, kind: input, shape index: {}]   ;;  %s1786_s1 = inlined_call_operand.hbm [shape: f32[16,16], index: 1, kind: input, shape index: {}]   ;;  %s1787_s2 = inlined_call_operand.vmem [shape: f32[2,16,16,4], index: 2, kind: output, shape index: {}]  }
   0x1   :  { %9 = vsyncpa [#allocation3 + $0x1], 0 }
   0x2   :  { %10 = vsyncpa [#allocation5], 0  ;;  %s1500_s9 = smov 0   ;;  %s1502_s10 = smov 0  }
   0x3   :  { %s1504_s11 = smov 0   ;;  %s1506_s12 = smov 0  }
   0x4   :  { %s1508_s13 = smov 0   ;;  %s1510_s14 = smov 0  }
   0x5 LB: > { %s1239_s15 = sadd.s32 4294967295, %s1474_s14   ;;  %p50_p0 = scmp.ne.s32.totalorder %s1458_s10, %s1454_s9  ;;  %s1474_s14 = sphi %s1510_s14, %s16_s14   ;;  %s1470_s13 = sphi %s1508_s13, %s1796_s13   ;;  %s1466_s12 = sphi %s1506_s12, %s1795_s12   ;;  %s1462_s11 = sphi %s1504_s11, %s1794_s11   ;;  %s1458_s10 = sphi %s1502_s10, %s1793_s10   ;;  %s1454_s9 = sphi %s1500_s9, %s1792_s9  }
   0x6   : > { %p1530_p1 = scmp.eq.s32.totalorder %s1239_s15, 0  ;;  %p1241_p2 = scmp.ge.s32.totalorder %s1474_s14, 1 }
   0x7   : > { %p110_p3 = scmp.lt.s32.totalorder %s1474_s14, 3  ;;  %s121_s20 = sshll.u32 %s1786_s1, 4  ;;  %s122_s20 = int_to_ptr.hbm [resolvable:$true] %s121_s20 }
   0x8   : > { %p1538_p4 = por %p1530_p1, %p50_p0  ;;  %s1476_s22 = smov [#allocation4]  }
   0x9   : > { %p1545_p5 = pnand %p1241_p2, %p110_p3  ;;  %s123_s23 = sshll.u32 %s1476_s22, 4  ;;  %s124_s23 = int_to_ptr.vmem [resolvable:$true] %s123_s23 }
   0xa   : > { %s1477_s24 = smov 128   ;;  %s1478_s25 = smov 8  }
   0xb   : > { %p1292_p6 = pneg %p1545_p5  ;;  %s28_s26 = sadd.s32 1, %s1470_s13 }
   0xc   : > { %p30_p8 = scmp.ge.s32.totalorder %s28_s26, 2  ;;  %p44_p9 = scmp.ne.s32.totalorder %s1462_s11, %s1458_s10 }
   0xd   : > { %p1293_p7 = pnand %p1292_p6, %p1530_p1  ;;  %p45_p10 = scmp.eq.s32.totalorder %s1474_s14, 0 }
   0xe   : > { %s1798_s26 = smov (%p30_p8, %s28_s26), 0  ;;  %s37_s27 = sadd.s32 1, %s1462_s11 }
   0xf   : > { %1295 = dma.hbm_to_vmem [thread:$0]  (!%p1293_p7), %s122_s20, 256, %s124_s23, [#allocation5], %s1477_s24, %s1477_s24, %s1478_s25  }
  0x10   : > { %p1560_p11 = por %p45_p10, %p44_p9  ;;  %s32_s29 = ssub.s32 %s1470_s13, %s1798_s26 }
  0x11   : > { %s137_s30 = sand.u32 1, %s1462_s11   ;;  %p35_p12 = scmp.eq.s32.totalorder %s32_s29, 0 }
  0x12   : > { %p1301_p13 = scmp.lt.s32.totalorder %s1474_s14, 2  ;;  %s1244_s3 = sshll.u32 %s137_s30, 4 }
  0x13   : > { %s1284_s4 = sshll.u32 %s1470_s13, 4  ;;  %s141_s15 = scalar_lea.vmem [#allocation2], %s1244_s3 }
  0x14   : > { %s1570_s5 = scalar_select %p35_p12, %s1462_s11, %s37_s27  }
  0x15   : > { %s148_s8 = scalar_lea.hbm %s1785_s0, %s1284_s4  ;;  %s151_s18 = sshll.u32 %s141_s15, 4  ;;  %s152_s18 = int_to_ptr.vmem [resolvable:$true] %s151_s18 }
  0x16   : > { %s149_s9 = sshll.u32 %s148_s8, 4  ;;  %p1297_p0 = pnand %p1301_p13, %p1560_p11  ;;  %s150_s9 = int_to_ptr.hbm [resolvable:$true] %s149_s9 }
  0x17   : > { %s138_s19 = scalar_lea.sflag [#allocation3], %s137_s30  ;;  %163 = sbr.rel (%p1545_p5) target bundleno = 491 (0x1eb), region = 28 }
  0x18   : > { %1299 = dma.hbm_to_vmem [thread:$0]  (!%p1297_p0), %s150_s9, 256, %s152_s18, %s138_s19, %s1477_s24, %s1477_s24, %s1478_s25  }
  0x19   : > { %s165_s20 = sand.u32 (!%p1545_p5), 1, %s1458_s10  }
  0x1a   : > { %s1248_s22 = sshll.u32 (!%p1545_p5), %s165_s20, 4  ;;  %s166_s23 = scalar_lea.sflag (!%p1545_p5), [#allocation3], %s165_s20 }
  0x1b   : > { %s169_s27 = scalar_lea.vmem (!%p1545_p5), [#allocation2], %s1248_s22 }
  0x1c   : > { %1445 = dma.done.wait (%p1538_p4), %s166_s23, 256  }
  0x1d   : > { %1447 = vsyncadd (%p1538_p4), %s166_s23, 4294967040 }
  0x1e   : > { %1449 = dma.done.wait (%p1530_p1), [#allocation5], 256  }
  0x1f   : > { %1451 = vsyncadd (%p1530_p1), [#allocation5], 4294967040  ;;  %vm215_vm0 = vcmask 130048   ;;  %v213_v0 = vld [vmem:[%s169_s27] sm:$0xff]  ;;  %v214_v1 = vld [vmem:[%s169_s27 + $0x8] sm:$0xff]  ;;  %s1479_s21 = smov 112  }
  0x20   : > { %v212_v2 = vld [vmem:[#allocation4 + $0x8] sm:$0xff]  ;;  %444 = vrot.lane.b32.xlu0 %v213_v0, %s1479_s21  ;;  %s1480_s24 = smov 96   ;;  %v211_v4 = vld [vmem:[#allocation4] sm:$0xff]  ;;  %v217_v5 = vsel %vm215_vm0, %v213_v0, 0  ;;  %v220_v6 = vsel %vm215_vm0, %v214_v1, 0  ;;  %s1481_s17 = smov 80  }
  0x21   : > { %674 = vrot.lane.b32.xlu1 %v213_v0, %s1480_s24  ;;  %v1590_v3 = vand.u32 4294901760, %v212_v2  ;;  %904 = vrot.lane.b32.xlu2 %v213_v0, %s1481_s17  ;;  %v1594_v7 = vand.u32 4294901760, %v211_v4  ;;  %v240_v8 = vand.u32 4294901760, %v217_v5  ;;  %v248_v9 = vand.u32 4294901760, %v220_v6  ;;  %p202_p1 = scmp.lt.s32.totalorder %s1466_s12, 1  ;;  %s1482_s30 = smov 116  }
  0x22   : > { %vm412_vm1 = vcmask 31744   ;;  %s1483_s3 = smov 120  }
  0x23   : > { %237 = vmatpush.msra.mxu0 %v1590_v3  ;;  %v1598_v10 = vsub.f32 %v212_v2, %v1590_v3  ;;  %338 = vmatpush.msra.mxu3 %v1590_v3  ;;  %v241_v11 = vsub.f32 %v217_v5, %v240_v8  ;;  %v1602_v12 = vsub.f32 %v211_v4, %v1594_v7  ;;  %s1800_s12 = smov (!%p202_p1, %s1466_s12), 1 }
  0x24   : > { %v249_v13 = vsub.f32 %v220_v6, %v248_v9  ;;  %s1285_s16 = sshll.u32 %s1800_s12, 8  ;;  %s1484_s12 = smov 124  }
  0x25   : > { %239 = vmatpush.msra.mxu0 %v1594_v7  ;;  %v1606_v14 = vand.u32 4294901760, %v1598_v10  ;;  %340 = vmatpush.msra.mxu3 %v1594_v7  ;;  %v242_v15 = vand.u32 4294901760, %v241_v11  ;;  %v1610_v16 = vand.u32 4294901760, %v1602_v12  ;;  %s1677_s29 = scalar_lea.vmem %s1787_s2, %s1285_s16 }
  0x26   : > { %308 = vmatpush.msra.mxu2 %v1598_v10  ;;  %v250_v20 = vand.u32 4294901760, %v249_v13 }
  0x27   : > { %v274_v17 = vsub.f32 %v1598_v10, %v1606_v14  ;;  %371 = vmatpush.msrb.mxu0 %v1606_v14  ;;  %v243_v18 = vsub.f32 %v241_v11, %v242_v15  ;;  %v280_v19 = vsub.f32 %v1602_v12, %v1610_v16  ;;  %344 = vmatmul.f32.vlgmr.msra.gmra.mxu3 %v242_v15 }
  0x28   : > { %311 = vmatpush.msra.mxu2 %v1602_v12  ;;  %446 = vrot.lane.b32.xlu0 %v214_v1, %s1479_s21  ;;  %v251_v24 = vsub.f32 %v249_v13, %v250_v20 }
  0x29   : > { %676 = vrot.lane.b32.xlu1 %v214_v1, %s1480_s24  ;;  %v1621_v21 = vand.u32 4294901760, %v274_v17  ;;  %906 = vrot.lane.b32.xlu2 %v214_v1, %s1481_s17  ;;  %v244_v22 = vand.u32 4294901760, %v243_v18  ;;  %v1623_v23 = vand.u32 4294901760, %v280_v19 }
  0x2a   : > { %375 = vmatpush.msrb.mxu0 %v1610_v16  ;;  %314 = vmatmul.f32.vlgmr.msra.gmra.mxu2 %v241_v11  ;;  %v252_v25 = vand.u32 4294901760, %v251_v24 }
  0x2b   : > { %276 = vmatpush.msra.mxu1 %v1621_v21  ;;  %245 = vmatmul.f32.vlgmr.msra.gmra.mxu0 %v244_v22 }
  0x2c   : > { %467 = vmatpush.msrb.mxu2 %v1590_v3  ;;  %506 = vmatpush.msrb.mxu3 %v1621_v21 }
  0x2d   : > { %282 = vmatpush.msra.mxu1 %v1623_v23  ;;  %538 = vmatpush.msra.mxu0 %v1598_v10 }
  0x2e   : > { %284 = vmatmul.f32.vlgmr.msra.gmra.mxu1 %v240_v8  ;;  %512 = vmatpush.msrb.mxu3 %v1623_v23 }
  0x2f   : > { %400 = vmatpush.msrb.mxu1 %v1590_v3  ;;  %350 = vmatmul.f32.gmra.mxu3 %v250_v20 }
  0x30   : > { %469 = vmatpush.msrb.mxu2 %v1594_v7  ;;  %541 = vmatpush.msra.mxu0 %v1602_v12 }
  0x31   : > { %402 = vmatpush.msrb.mxu1 %v1594_v7  ;;  %630 = vmatpush.msra.mxu3 %v1590_v3 }
  0x32   : > { %601 = vmatpush.msra.mxu2 %v1606_v14 }
  0x33   : > { %568 = vmatpush.msra.mxu1 %v1590_v3  ;;  %319 = vmatmul.f32.gmra.mxu2 %v249_v13 }
  0x34   : > { %253 = vmatmul.f32.gmra.mxu0 %v252_v25  ;;  %632 = vmatpush.msra.mxu3 %v1594_v7 }
  0x35   : > { %570 = vmatpush.msra.mxu1 %v1594_v7  ;;  %605 = vmatpush.msra.mxu2 %v1610_v16 }
  0x36   : > { %288 = vmatmul.f32.gmra.mxu1 %v248_v9 }
  0x3c   : > { %377 = vmatmul.f32.vlgmr.msrb.gmra.mxu0 %v240_v8 }
  0x3d   : > { %697 = vmatpush.msrb.mxu0 %v1590_v3 }
  0x3e   : > { %404 = vmatmul.f32.vlgmr.msrb.gmra.mxu1 %v240_v8 }
  0x3f   : > { %699 = vmatpush.msrb.mxu0 %v1594_v7  ;;  %736 = vmatpush.msrb.mxu1 %v1621_v21 }
  0x41   : > { %742 = vmatpush.msrb.mxu1 %v1623_v23 }
  0x44   : > { %381 = vmatmul.f32.gmra.mxu0 %v248_v9 }
  0x46   : > { %408 = vmatmul.f32.gmra.mxu1 %v248_v9 }
  0x7b   : > { %v905_v54 = vpop.permute.xlu2 %904 }
  0x7c   : > { %v908_v55 = vsel %vm215_vm0, %v905_v54, 0 }
  0x7d   : > { %v930_v56 = vand.u32 4294901760, %v908_v55 }
  0x7f   : > { %v931_v58 = vsub.f32 %v908_v55, %v930_v56 }
  0x81   : > { %v932_v60 = vand.u32 4294901760, %v931_v58 }
  0x83   : > { %v907_v57 = vpop.permute.xlu2 %906  ;;  %v933_v0 = vsub.f32 %v931_v58, %v932_v60 }
  0x84   : > { %v910_v59 = vsel %vm215_vm0, %v907_v57, 0 }
  0x85   : > { %v938_v61 = vand.u32 4294901760, %v910_v59 }
  0x87   : > { %v939_v1 = vsub.f32 %v910_v59, %v938_v61 }
  0x89   : > { %v940_v4 = vand.u32 4294901760, %v939_v1 }
  0x8b   : > { %v941_v9 = vsub.f32 %v939_v1, %v940_v4 }
  0x92   : > { %v445_v26 = vpop.permute.xlu0 %444 }
  0x93   : > { %v675_v27 = vpop.permute.xlu1 %674  ;;  %v448_v28 = vsel %vm215_vm0, %v445_v26, 0 }
  0x94   : > { %v678_v29 = vsel %vm215_vm0, %v675_v27, 0  ;;  %v470_v30 = vand.u32 4294901760, %v448_v28 }
  0x95   : > { %v700_v31 = vand.u32 4294901760, %v678_v29 }
  0x96   : > { %v471_v32 = vsub.f32 %v448_v28, %v470_v30  ;;  %514 = vmatmul.f32.vlgmr.msrb.gmra.mxu3 %v470_v30 }
  0x97   : > { %798 = vmatpush.msrb.mxu3 %v1590_v3  ;;  %v701_v34 = vsub.f32 %v678_v29, %v700_v31 }
  0x98   : > { %v472_v33 = vand.u32 4294901760, %v471_v32  ;;  %544 = vmatmul.f32.vlgmr.msra.gmra.mxu0 %v471_v32 }
  0x99   : > { %800 = vmatpush.msrb.mxu3 %v1594_v7  ;;  %831 = vmatpush.msra.mxu0 %v1606_v14  ;;  %v702_v41 = vand.u32 4294901760, %v701_v34 }
  0x9a   : > { %v447_v35 = vpop.permute.xlu0 %446  ;;  %574 = vmatmul.f32.vlgmr.msra.gmra.mxu1 %v472_v33  ;;  %v473_v36 = vsub.f32 %v471_v32, %v472_v33 }
  0x9b   : > { %v677_v37 = vpop.permute.xlu1 %676  ;;  %v450_v38 = vsel %vm215_vm0, %v447_v35, 0  ;;  %835 = vmatpush.msra.mxu0 %v1610_v16  ;;  %860 = vmatpush.msra.mxu1 %v1590_v3  ;;  %v703_v45 = vsub.f32 %v701_v34, %v702_v41 }
  0x9c   : > { %v680_v39 = vsel %vm215_vm0, %v677_v37, 0  ;;  %v478_v40 = vand.u32 4294901760, %v450_v38  ;;  %v474_v42 = vand.u32 4294901760, %v473_v36 }
  0x9d   : > { %v708_v43 = vand.u32 4294901760, %v680_v39  ;;  %862 = vmatpush.msra.mxu1 %v1594_v7  ;;  %v704_v49 = vand.u32 4294901760, %v703_v45 }
  0x9e   : > { %v479_v44 = vsub.f32 %v450_v38, %v478_v40  ;;  %475 = vmatmul.f32.vlgmr.msrb.gmra.mxu2 %v474_v42  ;;  %518 = vmatmul.f32.gmra.mxu3 %v478_v40 }
  0x9f   : > { %768 = vmatpush.msrb.mxu2 %v1598_v10  ;;  %v709_v47 = vsub.f32 %v680_v39, %v708_v43 }
  0xa0   : > { %549 = vmatmul.f32.gmra.mxu0 %v479_v44  ;;  %v480_v46 = vand.u32 4294901760, %v479_v44 }
  0xa1   : > { %771 = vmatpush.msrb.mxu2 %v1602_v12  ;;  %v710_v51 = vand.u32 4294901760, %v709_v47 }
  0xa2   : > { %580 = vmatmul.f32.gmra.mxu1 %v480_v46  ;;  %v481_v48 = vsub.f32 %v479_v44, %v480_v46 }
  0xa3   : > { %v711_v52 = vsub.f32 %v709_v47, %v710_v51 }
  0xa4   : > { %v482_v50 = vand.u32 4294901760, %v481_v48 }
  0xa5   : > { %v712_v53 = vand.u32 4294901760, %v711_v52 }
  0xa6   : > { %483 = vmatmul.f32.gmra.mxu2 %v482_v50  ;;  %634 = vmatmul.f32.vlgmr.msra.gmra.mxu3 %v470_v30 }
  0xa7   : > { %966 = vmatpush.msra.mxu3 %v1621_v21 }
  0xa8   : > { %705 = vmatmul.f32.vlgmr.msrb.gmra.mxu0 %v704_v49  ;;  %v246_v62 = vpop.f32.mrf.mxu0 }
  0xa9   : > { %972 = vmatpush.msra.mxu3 %v1623_v23  ;;  %998 = vmatpush.msrb.mxu0 %v1598_v10 }
  0xaa   : > { %744 = vmatmul.f32.vlgmr.msrb.gmra.mxu1 %v700_v31  ;;  %v345_v10 = vpop.f32.mrf.mxu3 }
  0xab   : > { %1001 = vmatpush.msrb.mxu0 %v1602_v12  ;;  %1028 = vmatpush.msrb.mxu1 %v1590_v3  ;;  %v285_v63 = vpop.f32.mrf.mxu1  ;;  %v942_v12 = vand.u32 4294901760, %v941_v9 }
  0xac   : > { %v286_v2 = vadd.f32 %v285_v63, %v246_v62 }
  0xad   : > { %1030 = vmatpush.msrb.mxu1 %v1594_v7  ;;  %v315_v5 = vpop.f32.mrf.mxu2 }
  0xae   : > { %607 = vmatmul.f32.vlgmr.msra.gmra.mxu2 %v470_v30  ;;  %638 = vmatmul.f32.gmra.mxu3 %v478_v40  ;;  %v316_v8 = vadd.f32 %v315_v5, %v286_v2 }
  0xaf   : > { %927 = vmatpush.msra.mxu2 %v1590_v3 }
  0xb0   : > { %713 = vmatmul.f32.gmra.mxu0 %v712_v53  ;;  %v346_v11 = vadd.f32 %v345_v10, %v316_v8 }
  0xb1   : > { %929 = vmatpush.msra.mxu2 %v1594_v7  ;;  %v254_v6 = vpop.f32.mrf.mxu0 }
  0xb2   : > { %748 = vmatmul.f32.gmra.mxu1 %v708_v43  ;;  %v351_v20 = vpop.f32.mrf.mxu3 }
  0xb6   : > { %611 = vmatmul.f32.gmra.mxu2 %v478_v40  ;;  %804 = vmatmul.f32.vlgmr.msrb.gmra.mxu3 %v702_v41  ;;  %v320_v18 = vpop.f32.mrf.mxu2 }
  0xb7   : > { %1090 = vmatpush.msrb.mxu3 %v1590_v3  ;;  %v934_v3 = vand.u32 4294901760, %v933_v0 }
  0xb8   : > { %837 = vmatmul.f32.vlgmr.msra.gmra.mxu0 %v700_v31 }
  0xb9   : > { %1092 = vmatpush.msrb.mxu3 %v1594_v7  ;;  %v289_v7 = vpop.f32.mrf.mxu1  ;;  %v378_v13 = vpop.f32.mrf.mxu0 }
  0xba   : > { %864 = vmatmul.f32.vlgmr.msra.gmra.mxu1 %v700_v31  ;;  %v290_v17 = vadd.f32 %v289_v7, %v254_v6 }
  0xbc   : > { %v321_v19 = vadd.f32 %v320_v18, %v290_v17 }
  0xbe   : > { %774 = vmatmul.f32.vlgmr.msrb.gmra.mxu2 %v701_v34  ;;  %810 = vmatmul.f32.gmra.mxu3 %v710_v51  ;;  %v352_v21 = vadd.f32 %v351_v20, %v321_v19 }
  0xbf   : > { %1061 = vmatpush.msrb.mxu2 %v1606_v14  ;;  %v379_v14 = vadd.f32 %v378_v13, %v346_v11 }
  0xc0   : > { %841 = vmatmul.f32.gmra.mxu0 %v708_v43 }
  0xc1   : > { %1065 = vmatpush.msrb.mxu2 %v1610_v16  ;;  %v405_v15 = vpop.f32.mrf.mxu1  ;;  %v382_v22 = vpop.f32.mrf.mxu0 }
  0xc2   : > { %868 = vmatmul.f32.gmra.mxu1 %v708_v43  ;;  %v406_v16 = vadd.f32 %v405_v15, %v379_v14  ;;  %v383_v23 = vadd.f32 %v382_v22, %v352_v21 }
  0xc4   : > { %413 = vst.msk [vmem:[%s1677_s29] sm:$0xff] %vm412_vm1, %v406_v16  ;;  %435 = vrot.lane.b32.xlu1 %v406_v16, %s1482_s30  ;;  %426 = vrot.lane.b32.xlu2 %v406_v16, %s1483_s3 }
  0xc5   : > { %417 = vrot.lane.b32.xlu0 %v406_v16, %s1484_s12 }
  0xc6   : > { %779 = vmatmul.f32.gmra.mxu2 %v709_v47  ;;  %974 = vmatmul.f32.vlgmr.msra.gmra.mxu3 %v930_v56 }
  0xc8   : > { %1004 = vmatmul.f32.vlgmr.msrb.gmra.mxu0 %v931_v58 }
  0xc9   : > { %v409_v24 = vpop.f32.mrf.mxu1 }
  0xca   : > { %1034 = vmatmul.f32.vlgmr.msrb.gmra.mxu1 %v932_v60  ;;  %v410_v25 = vadd.f32 %v409_v24, %v383_v23 }
  0xcc   : > { %414 = vst.msk [vmem:[%s1677_s29 + $0x8] sm:$0xff] %vm412_vm1, %v410_v25  ;;  %437 = vrot.lane.b32.xlu2 %v410_v25, %s1482_s30  ;;  %419 = vrot.lane.b32.xlu1 %v410_v25, %s1484_s12 }
  0xcd   : > { %428 = vrot.lane.b32.xlu0 %v410_v25, %s1483_s3 }
  0xce   : > { %935 = vmatmul.f32.vlgmr.msra.gmra.mxu2 %v934_v3  ;;  %978 = vmatmul.f32.gmra.mxu3 %v938_v61 }
  0xd0   : > { %1009 = vmatmul.f32.gmra.mxu0 %v939_v1 }
  0xd2   : > { %1040 = vmatmul.f32.gmra.mxu1 %v940_v4 }
  0xd6   : > { %943 = vmatmul.f32.gmra.mxu2 %v942_v12  ;;  %1094 = vmatmul.f32.vlgmr.msrb.gmra.mxu3 %v930_v56 }
  0xde   : > { %1067 = vmatmul.f32.vlgmr.msrb.gmra.mxu2 %v930_v56  ;;  %1098 = vmatmul.f32.gmra.mxu3 %v938_v61 }
  0xe6   : > { %1071 = vmatmul.f32.gmra.mxu2 %v938_v61 }
 0x115   : > { %v545_v27 = vpop.f32.mrf.mxu0 }
 0x117   : > { %v575_v28 = vpop.f32.mrf.mxu1 }
 0x119   : > { %v515_v26 = vpop.f32.mrf.mxu3 }
 0x11d   : > { %v550_v31 = vpop.f32.mrf.mxu0 }
 0x11e   : > { %v427_v6 = vpop.permute.xlu2 %426 }
 0x11f   : > { %v581_v32 = vpop.f32.mrf.mxu1  ;;  %1254 = vst.msk [vmem:[%s1677_s29 + $0x20] sm:$0xff] %vm412_vm1, %v427_v6 }
 0x121   : > { %v476_v29 = vpop.f32.mrf.mxu2  ;;  %v519_v30 = vpop.f32.mrf.mxu3 }
 0x122   : > { %v516_v33 = vadd.f32 %v515_v26, %v476_v29 }
 0x124   : > { %v546_v36 = vadd.f32 %v545_v27, %v516_v33 }
 0x125   : > { %v706_v37 = vpop.f32.mrf.mxu0 }
 0x126   : > { %v576_v40 = vadd.f32 %v575_v28, %v546_v36  ;;  %v438_v13 = vpop.permute.xlu2 %437 }
 0x127   : > { %v745_v38 = vpop.f32.mrf.mxu1  ;;  %1257 = vst.msk [vmem:[%s1677_s29 + $0x38] sm:$0xff] %vm412_vm1, %v438_v13 }
 0x128   : > { %v746_v53 = vadd.f32 %v745_v38, %v706_v37 }
 0x129   : > { %v484_v34 = vpop.f32.mrf.mxu2  ;;  %v635_v35 = vpop.f32.mrf.mxu3 }
 0x12a   : > { %v520_v39 = vadd.f32 %v519_v30, %v484_v34 }
 0x12c   : > { %v551_v44 = vadd.f32 %v550_v31, %v520_v39 }
 0x12d   : > { %v714_v46 = vpop.f32.mrf.mxu0 }
 0x12e   : > { %v582_v47 = vadd.f32 %v581_v32, %v551_v44 }
 0x12f   : > { %v749_v51 = vpop.f32.mrf.mxu1 }
 0x130   : > { %v750_v61 = vadd.f32 %v749_v51, %v714_v46 }
 0x131   : > { %v608_v41 = vpop.f32.mrf.mxu2  ;;  %v639_v42 = vpop.f32.mrf.mxu3 }
 0x132   : > { %v609_v43 = vadd.f32 %v608_v41, %v576_v40 }
 0x134   : > { %v636_v45 = vadd.f32 %v635_v35, %v609_v43 }
 0x135   : > { %v838_v57 = vpop.f32.mrf.mxu0 }
 0x136   : > { %1258 = vst.msk [vmem:[%s1677_s29 + $0x40] sm:$0xff] %vm412_vm1, %v636_v45  ;;  %656 = vrot.lane.b32.xlu2 %v636_v45, %s1483_s3  ;;  %647 = vrot.lane.b32.xlu0 %v636_v45, %s1484_s12  ;;  %v436_v10 = vpop.permute.xlu1 %435 }
 0x137   : > { %665 = vrot.lane.b32.xlu1 %v636_v45, %s1482_s30  ;;  %v865_v59 = vpop.f32.mrf.mxu1  ;;  %v418_v11 = vpop.permute.xlu0 %417  ;;  %1256 = vst.msk [vmem:[%s1677_s29 + $0x30] sm:$0xff] %vm412_vm1, %v436_v10 }
 0x138   : > { %1252 = vst.msk [vmem:[%s1677_s29 + $0x10] sm:$0xff] %vm412_vm1, %v418_v11 }
 0x139   : > { %v612_v48 = vpop.f32.mrf.mxu2  ;;  %v805_v49 = vpop.f32.mrf.mxu3 }
 0x13a   : > { %v613_v50 = vadd.f32 %v612_v48, %v582_v47 }
 0x13c   : > { %v640_v52 = vadd.f32 %v639_v42, %v613_v50 }
 0x13d   : > { %v842_v3 = vpop.f32.mrf.mxu0 }
 0x13e   : > { %1259 = vst.msk [vmem:[%s1677_s29 + $0x48] sm:$0xff] %vm412_vm1, %v640_v52  ;;  %667 = vrot.lane.b32.xlu2 %v640_v52, %s1482_s30  ;;  %658 = vrot.lane.b32.xlu0 %v640_v52, %s1483_s3  ;;  %v420_v33 = vpop.permute.xlu1 %419 }
 0x13f   : > { %649 = vrot.lane.b32.xlu1 %v640_v52, %s1484_s12  ;;  %v869_v5 = vpop.f32.mrf.mxu1  ;;  %v429_v32 = vpop.permute.xlu0 %428  ;;  %1253 = vst.msk [vmem:[%s1677_s29 + $0x18] sm:$0xff] %vm412_vm1, %v420_v33 }
 0x140   : > { %1255 = vst.msk [vmem:[%s1677_s29 + $0x28] sm:$0xff] %vm412_vm1, %v429_v32 }
 0x141   : > { %v775_v54 = vpop.f32.mrf.mxu2  ;;  %v811_v56 = vpop.f32.mrf.mxu3 }
 0x142   : > { %v776_v55 = vadd.f32 %v775_v54, %v746_v53 }
 0x144   : > { %v806_v58 = vadd.f32 %v805_v49, %v776_v55 }
 0x145   : > { %v1005_v14 = vpop.f32.mrf.mxu0 }
 0x146   : > { %v839_v60 = vadd.f32 %v838_v57, %v806_v58 }
 0x147   : > { %v1035_v17 = vpop.f32.mrf.mxu1 }
 0x148   : > { %v866_v62 = vadd.f32 %v865_v59, %v839_v60 }
 0x149   : > { %v780_v63 = vpop.f32.mrf.mxu2  ;;  %v975_v2 = vpop.f32.mrf.mxu3 }
 0x14a   : > { %1266 = vst.msk [vmem:[%s1677_s29 + $0x80] sm:$0xff] %vm412_vm1, %v866_v62  ;;  %v781_v0 = vadd.f32 %v780_v63, %v750_v61  ;;  %886 = vrot.lane.b32.xlu2 %v866_v62, %s1483_s3  ;;  %877 = vrot.lane.b32.xlu0 %v866_v62, %s1484_s12 }
 0x14b   : > { %895 = vrot.lane.b32.xlu1 %v866_v62, %s1482_s30 }
 0x14c   : > { %v812_v1 = vadd.f32 %v811_v56, %v781_v0 }
 0x14d   : > { %v1010_v23 = vpop.f32.mrf.mxu0 }
 0x14e   : > { %v843_v4 = vadd.f32 %v842_v3, %v812_v1 }
 0x14f   : > { %v1041_v26 = vpop.f32.mrf.mxu1 }
 0x150   : > { %v870_v7 = vadd.f32 %v869_v5, %v843_v4 }
 0x151   : > { %v936_v8 = vpop.f32.mrf.mxu2  ;;  %v979_v9 = vpop.f32.mrf.mxu3 }
 0x152   : > { %1267 = vst.msk [vmem:[%s1677_s29 + $0x88] sm:$0xff] %vm412_vm1, %v870_v7  ;;  %897 = vrot.lane.b32.xlu2 %v870_v7, %s1482_s30  ;;  %888 = vrot.lane.b32.xlu0 %v870_v7, %s1483_s3  ;;  %v976_v12 = vadd.f32 %v975_v2, %v936_v8 }
 0x153   : > { %879 = vrot.lane.b32.xlu1 %v870_v7, %s1484_s12 }
 0x154   : > { %v1006_v16 = vadd.f32 %v1005_v14, %v976_v12 }
 0x156   : > { %v1036_v19 = vadd.f32 %v1035_v17, %v1006_v16 }
 0x159   : > { %v944_v15 = vpop.f32.mrf.mxu2  ;;  %v1095_v20 = vpop.f32.mrf.mxu3 }
 0x15a   : > { %v980_v18 = vadd.f32 %v979_v9, %v944_v15 }
 0x15c   : > { %v1011_v24 = vadd.f32 %v1010_v23, %v980_v18 }
 0x15e   : > { %v1042_v27 = vadd.f32 %v1041_v26, %v1011_v24 }
 0x161   : > { %v1068_v21 = vpop.f32.mrf.mxu2  ;;  %v1099_v30 = vpop.f32.mrf.mxu3 }
 0x162   : > { %v1069_v22 = vadd.f32 %v1068_v21, %v1036_v19 }
 0x164   : > { %v1096_v25 = vadd.f32 %v1095_v20, %v1069_v22 }
 0x166   : > { %1274 = vst.msk [vmem:[%s1677_s29 + $0xc0] sm:$0xff] %vm412_vm1, %v1096_v25  ;;  %1116 = vrot.lane.b32.xlu2 %v1096_v25, %s1483_s3  ;;  %1107 = vrot.lane.b32.xlu0 %v1096_v25, %s1484_s12 }
 0x169   : > { %v1072_v28 = vpop.f32.mrf.mxu2 }
 0x16a   : > { %v1073_v29 = vadd.f32 %v1072_v28, %v1042_v27 }
 0x16c   : > { %v1100_v31 = vadd.f32 %v1099_v30, %v1073_v29 }
 0x16e   : > { %1275 = vst.msk [vmem:[%s1677_s29 + $0xc8] sm:$0xff] %vm412_vm1, %v1100_v31  ;;  %1127 = vrot.lane.b32.xlu2 %v1100_v31, %s1482_s30  ;;  %1118 = vrot.lane.b32.xlu0 %v1100_v31, %s1483_s3 }
 0x16f   : > { %1109 = vrot.lane.b32.xlu1 %v1100_v31, %s1484_s12 }
 0x177   : > { %1125 = vrot.lane.b32.xlu1 %v1096_v25, %s1482_s30 }
 0x190   : > { %v657_v34 = vpop.permute.xlu2 %656 }
 0x191   : > { %1262 = vst.msk [vmem:[%s1677_s29 + $0x60] sm:$0xff] %vm412_vm1, %v657_v34 }
 0x198   : > { %v668_v35 = vpop.permute.xlu2 %667 }
 0x199   : > { %1265 = vst.msk [vmem:[%s1677_s29 + $0x78] sm:$0xff] %vm412_vm1, %v668_v35 }
 0x1a4   : > { %v887_v36 = vpop.permute.xlu2 %886 }
 0x1a5   : > { %1270 = vst.msk [vmem:[%s1677_s29 + $0xa0] sm:$0xff] %vm412_vm1, %v887_v36 }
 0x1a8   : > { %v648_v37 = vpop.permute.xlu0 %647 }
 0x1a9   : > { %1260 = vst.msk [vmem:[%s1677_s29 + $0x50] sm:$0xff] %vm412_vm1, %v648_v37  ;;  %v666_v38 = vpop.permute.xlu1 %665 }
 0x1aa   : > { %1264 = vst.msk [vmem:[%s1677_s29 + $0x70] sm:$0xff] %vm412_vm1, %v666_v38 }
 0x1ac   : > { %v898_v39 = vpop.permute.xlu2 %897 }
 0x1ad   : > { %1273 = vst.msk [vmem:[%s1677_s29 + $0xb8] sm:$0xff] %vm412_vm1, %v898_v39 }
 0x1b0   : > { %v659_v40 = vpop.permute.xlu0 %658 }
 0x1b1   : > { %1263 = vst.msk [vmem:[%s1677_s29 + $0x68] sm:$0xff] %vm412_vm1, %v659_v40  ;;  %v650_v41 = vpop.permute.xlu1 %649 }
 0x1b2   : > { %1261 = vst.msk [vmem:[%s1677_s29 + $0x58] sm:$0xff] %vm412_vm1, %v650_v41 }
 0x1bc   : > { %v878_v42 = vpop.permute.xlu0 %877 }
 0x1bd   : > { %1268 = vst.msk [vmem:[%s1677_s29 + $0x90] sm:$0xff] %vm412_vm1, %v878_v42  ;;  %v896_v43 = vpop.permute.xlu1 %895 }
 0x1be   : > { %1272 = vst.msk [vmem:[%s1677_s29 + $0xb0] sm:$0xff] %vm412_vm1, %v896_v43 }
 0x1c0   : > { %v1117_v44 = vpop.permute.xlu2 %1116 }
 0x1c1   : > { %1278 = vst.msk [vmem:[%s1677_s29 + $0xe0] sm:$0xff] %vm412_vm1, %v1117_v44 }
 0x1c4   : > { %v889_v45 = vpop.permute.xlu0 %888 }
 0x1c5   : > { %1271 = vst.msk [vmem:[%s1677_s29 + $0xa8] sm:$0xff] %vm412_vm1, %v889_v45  ;;  %v880_v46 = vpop.permute.xlu1 %879 }
 0x1c6   : > { %1269 = vst.msk [vmem:[%s1677_s29 + $0x98] sm:$0xff] %vm412_vm1, %v880_v46 }
 0x1c8   : > { %v1128_v47 = vpop.permute.xlu2 %1127 }
 0x1c9   : > { %1281 = vst.msk [vmem:[%s1677_s29 + $0xf8] sm:$0xff] %vm412_vm1, %v1128_v47 }
 0x1d8   : > { %v1108_v48 = vpop.permute.xlu0 %1107 }
 0x1d9   : > { %1276 = vst.msk [vmem:[%s1677_s29 + $0xd0] sm:$0xff] %vm412_vm1, %v1108_v48 }
 0x1e0   : > { %v1119_v49 = vpop.permute.xlu0 %1118 }
 0x1e1   : > { %1279 = vst.msk [vmem:[%s1677_s29 + $0xe8] sm:$0xff] %vm412_vm1, %v1119_v49  ;;  %v1110_v50 = vpop.permute.xlu1 %1109 }
 0x1e2   : > { %1277 = vst.msk [vmem:[%s1677_s29 + $0xd8] sm:$0xff] %vm412_vm1, %v1110_v50 }
 0x1e9   : > { %v1126_v51 = vpop.permute.xlu1 %1125 }
 0x1ea   : > { %1280 = vst.msk [vmem:[%s1677_s29 + $0xf0] sm:$0xff] %vm412_vm1, %v1126_v51 }
 0x1eb PF: > { %s16_s14 = sadd.s32 1, %s1474_s14   ;;  %s1792_s9 = smov %s1458_s10 }
 0x1ec   : > { %p13_p2 = scmp.ge.s32.totalorder %s16_s14, 4   ;;  %s1793_s10 = smov %s1462_s11 }
 0x1ed   : > { %s1794_s11 = smov %s1570_s5  ;;  %s1795_s12 = smov %s1470_s13 }
 0x1ee   : > { %s1796_s13 = smov %s1798_s26  ;;  %15 = sbr.rel (!%p13_p2) target bundleno = 5 (0x5), region = 87 }
 0x1f3   :  { %1164 = vsyncpa [#allocation3], 1 }
 0x1f4   :  { %1166 = vsyncpa [#allocation3 + $0x1], 1 }
 0x1f5   :  { %1167 = vsyncpa [#allocation5], 1 }

</bundles_post_ra>
